<compile_context>
chip_gen: v6e
topology: v6e:2x2x1
jax: 0.10.0
libtpu: 0.0.40
codegen_flags: <defaults>
</compile_context>

<pallas_src>
import functools

import jax
import jax.numpy as jnp
from jax.experimental import pallas as pl
from jax.experimental.pallas import tpu as pltpu


def _round_up(x, m):
    return ((x + m - 1) // m) * m


def _critic_kernel(
    sa_ref,       # (bt, I)   f32  state_action tile (shared by both nets)
    w_inp_ref,    # (I, 4*HP) mm   [in | h0_inp | h1_inp | h2_inp] x {net1,net2}
    b_in_ref,     # (1, HP)   f32
    w_hx_ref,     # (L, HP, HP) mm block-diag x-side hidden weights per layer
    b_h_ref,      # (L, 1, HP) f32
    w_out_ref,    # (HP, 2)   mm   col0 = net1 w_out, col1 = net2 w_out
    b_out_ref,    # (1, 2)    f32
    o_ref,        # (bt, 2)   f32  [q1 | q2]
    *,
    padded_width,
    num_hidden_layers,
):
    HP = padded_width
    mm_dtype = w_inp_ref.dtype

    # Keep elementwise path in f32 (v5e-safe); cast only matmul operands.
    inp = sa_ref[...].astype(mm_dtype)                           # (bt, I)

    # All inp-side contributions for both nets and all layers in ONE matmul.
    pre = jnp.dot(inp, w_inp_ref[...],
                  preferred_element_type=jnp.float32)            # (bt, 4*HP)

    # linear_in + relu (both nets side by side; padding lanes stay exactly 0).
    x = jnp.maximum(pre[:, 0:HP] + b_in_ref[...], 0.0)           # (bt, HP)

    # Dense hidden layers: relu(x @ blockdiag(Wx) + inp-part + bias).
    # (For H > 64 prefer two (bt,H)@(H,H) dots per layer instead of the
    #  zero-padded block-diagonal — scaling guard, not needed at H=32.)
    for l in range(num_hidden_layers):
        h = jnp.dot(x.astype(mm_dtype), w_hx_ref[l],
                    preferred_element_type=jnp.float32)          # (bt, HP)
        h = h + pre[:, HP * (l + 1):HP * (l + 2)] + b_h_ref[l]
        x = jnp.maximum(h, 0.0)

    # Output layer: one (bt,HP)@(HP,2) MXU matmul, bias fused in-kernel.
    q = jnp.dot(x.astype(mm_dtype), w_out_ref[...],
                preferred_element_type=jnp.float32)              # (bt, 2)
    o_ref[...] = q + b_out_ref[...]


def init_mlp_params(key, input_size, hidden_size, num_hidden_layers=3):
    """Deterministic parameter init (PyTorch-Linear-like uniform)."""
    hidden_aug = hidden_size + input_size
    params = {}

    def linear(k, fan_in, fan_out):
        kw, kb = jax.random.split(k)
        bound = 1.0 / jnp.sqrt(float(fan_in))
        w = jax.random.uniform(kw, (fan_out, fan_in), jnp.float32, -bound, bound)
        b = jax.random.uniform(kb, (fan_out,), jnp.float32, -bound, bound)
        return w, b

    keys = jax.random.split(key, 2 + num_hidden_layers)
    params["w_in"], params["b_in"] = linear(keys[0], input_size, hidden_size)
    params["w_h"], params["b_h"] = [], []
    for i in range(num_hidden_layers):
        w, b = linear(keys[1 + i], hidden_aug, hidden_size)
        params["w_h"].append(w)
        params["b_h"].append(b)
    params["w_out"], params["b_out"] = linear(keys[-1], hidden_size, 1)
    return params


def stack_critic_params(p1, p2, hidden_size, matmul_dtype=jnp.float32,
                        num_hidden_layers=3):
    """Pack both nets' params into the lane-aligned fused layout."""
    H = hidden_size
    H2 = 2 * H
    HP = _round_up(H2, 128)          # 128-lane-aligned per-layer chunk width
    f32 = jnp.float32
    L = num_hidden_layers

    def pad_lanes(a):                # (I, 2H) -> (I, HP), zero padded
        return jnp.pad(a, ((0, 0), (0, HP - a.shape[1])))

    def inp_pair(w1t, w2t):          # each (I, H) -> (I, HP)
        return pad_lanes(jnp.concatenate([w1t, w2t], axis=1))

    inp_blocks = [inp_pair(p1["w_in"].T, p2["w_in"].T)]          # linear_in
    wx_blocks, b_h_rows = [], []
    for l in range(L):
        w1t = p1["w_h"][l].T                                     # (H+I, H)
        w2t = p2["w_h"][l].T
        inp_blocks.append(inp_pair(w1t[H:], w2t[H:]))            # inp-side part
        blk = jnp.zeros((HP, HP), f32)
        blk = blk.at[:H, :H].set(w1t[:H])                        # net1 x-side
        blk = blk.at[H:H2, H:H2].set(w2t[:H])                    # net2 x-side
        wx_blocks.append(blk)
        b_h_rows.append(jnp.pad(
            jnp.concatenate([p1["b_h"][l], p2["b_h"][l]]), (0, HP - H2)))

    w_out = jnp.zeros((HP, 2), f32)
    w_out = w_out.at[:H, 0].set(p1["w_out"][0])
    w_out = w_out.at[H:H2, 1].set(p2["w_out"][0])

    return {
        "w_inp": jnp.concatenate(inp_blocks, axis=1).astype(matmul_dtype),  # (I, 4HP)
        "b_in": jnp.pad(jnp.concatenate([p1["b_in"], p2["b_in"]]),
                        (0, HP - H2))[None, :].astype(f32),                 # (1, HP)
        "w_hx": jnp.stack(wx_blocks, 0).astype(matmul_dtype),               # (L, HP, HP)
        "b_h": jnp.stack(b_h_rows, 0)[:, None, :].astype(f32),              # (L, 1, HP)
        "w_out": w_out.astype(matmul_dtype),                                # (HP, 2)
        "b_out": jnp.stack([p1["b_out"][0], p2["b_out"][0]])[None, :].astype(f32),  # (1, 2)
        "hp": HP,
        "num_hidden_layers": L,
        "matmul_dtype": matmul_dtype,
    }


def critic_forward(state, action, packed, hidden_size):
    """Returns (q1, q2), each (B, 1) float32 — matches Critic.forward."""
    del hidden_size  # packed already encodes the (padded) layout
    HP = packed["hp"]
    L = packed["num_hidden_layers"]
    mm_dtype = packed["matmul_dtype"]

    sa = jnp.concatenate([state, action], axis=1)                # (B, I) f32
    B, I = sa.shape

    # Batch tiling: single full block for small B; otherwise 512-row tiles
    # with a cdiv grid and a zero-padded tail (sliced off after the call).
    if B <= 512:
        bt, Bp = B, B
    else:
        bt = 512
        Bp = pl.cdiv(B, bt) * bt
        if Bp != B:
            sa = jnp.pad(sa, ((0, Bp - B), (0, 0)))
    grid = (Bp // bt,)

    def full(shape):
        zeros = (0,) * len(shape)
        return pl.BlockSpec(shape, lambda i, _z=zeros: _z)

    in_specs = [
        pl.BlockSpec((bt, I), lambda i: (i, 0)),   # sa (batch-tiled)
        full((I, 4 * HP)),                         # w_inp
        full((1, HP)),                             # b_in
        full((L, HP, HP)),                         # w_hx
        full((L, 1, HP)),                          # b_h
        full((HP, 2)),                             # w_out
        full((1, 2)),                              # b_out
    ]
    out_spec = pl.BlockSpec((bt, 2), lambda i: (i, 0))

    # Scoped-VMEM guard: weights are grid-invariant but BlockSpec still
    # double-buffers them; raise the limit only if the estimate needs it.
    wsz = jnp.dtype(mm_dtype).itemsize
    est = (2 * ((I * 4 * HP + L * HP * HP + HP * 2) * wsz      # weights x2 bufs
                + (HP + L * HP + 2) * 4                        # biases
                + bt * I * 4 + bt * 2 * 4)                     # io x2 bufs
           + bt * (5 * HP) * 4)                                # live intermediates
    cp = dict(dimension_semantics=("parallel",))
    if est > 32 * 1024 * 1024:
        cp["vmem_limit_bytes"] = min(est + (8 << 20), 100 * 1024 * 1024)

    kernel = functools.partial(_critic_kernel, padded_width=HP,
                               num_hidden_layers=L)

    q = pl.pallas_call(
        kernel,
        out_shape=jax.ShapeDtypeStruct((Bp, 2), jnp.float32),
        grid=grid,
        in_specs=in_specs,
        out_specs=out_spec,
        compiler_params=pltpu.CompilerParams(**cp),
    )(sa, packed["w_inp"], packed["b_in"], packed["w_hx"],
      packed["b_h"], packed["w_out"], packed["b_out"])

    q = q[:B]
    return q[:, 0:1], q[:, 1:2]


def _reference_mlp(sa, p):
    x = jax.nn.relu(sa @ p["w_in"].T + p["b_in"])
    for i in range(3):
        x = jnp.concatenate([x, sa], axis=1)
        x = jax.nn.relu(x @ p["w_h"][i].T + p["b_h"][i])
    return x @ p["w_out"].T + p["b_out"]


if __name__ == "__main__":
    key = jax.random.PRNGKey(0)
    k_state, k_action, k_net1, k_net2 = jax.random.split(key, 4)

    B, OBS, ACT, H = 2, 16, 8, 32

    state = jax.random.normal(k_state, (B, OBS), jnp.float32)
    action = jax.random.normal(k_action, (B, ACT), jnp.float32)

    p1 = init_mlp_params(k_net1, OBS + ACT, H)
    p2 = init_mlp_params(k_net2, OBS + ACT, H)

    # pure-JAX reference
    sa = jnp.concatenate([state, action], axis=1)
    r1 = _reference_mlp(sa, p1)
    r2 = _reference_mlp(sa, p2)

    # --- f32-operand path (numerics closest to the PyTorch module) ---
    packed_f32 = stack_critic_params(p1, p2, H, matmul_dtype=jnp.float32)
    q1, q2 = critic_forward(state, action, packed_f32, H)
    jax.block_until_ready((q1, q2))
    assert q1.shape == (B, 1) and q2.shape == (B, 1)
    assert jnp.allclose(q1, r1, rtol=1e-4, atol=1e-5)
    assert jnp.allclose(q2, r2, rtol=1e-4, atol=1e-5)

    # --- bf16 matmul-operand path (recommended on v6e/v7x): half the weight
    #     DMA / VMEM, ~2x MXU throughput; f32 accumulation + f32 bias/ReLU ---
    packed_bf16 = stack_critic_params(p1, p2, H, matmul_dtype=jnp.bfloat16)
    q1b, q2b = critic_forward(state, action, packed_bf16, H)
    jax.block_until_ready((q1b, q2b))
    assert jnp.allclose(q1b, r1, rtol=5e-2, atol=5e-2)
    assert jnp.allclose(q2b, r2, rtol=5e-2, atol=5e-2)

    print("KERNEL_OK")
</pallas_src>

<mosaic_0001>
module attributes {stable_mosaic.version = 11 : i64} {
  func.func @_critic_kernel(%arg0: i32, %arg1: memref<2x24xf32, #tpu.memory_space<vmem>>, %arg2: memref<24x512xf32, #tpu.memory_space<vmem>>, %arg3: memref<1x128xf32, #tpu.memory_space<vmem>>, %arg4: memref<3x128x128xf32, #tpu.memory_space<vmem>>, %arg5: memref<3x1x128xf32, #tpu.memory_space<vmem>>, %arg6: memref<128x2xf32, #tpu.memory_space<vmem>>, %arg7: memref<1x2xf32, #tpu.memory_space<vmem>>, %arg8: memref<2x2xf32, #tpu.memory_space<vmem>>) attributes {dimension_semantics = [#tpu.dimension_semantics<parallel>], iteration_bounds = array<i64: 1>, scalar_prefetch = 0 : i64, scratch_operands = 0 : i64, tpu.core_type = #tpu.core_type<tc>, window_params = [{transform_indices = @transform_0, window_bounds = array<i64: 2, 24>}, {pipeline_mode = #tpu.pipeline_mode<synchronous>, transform_indices = @transform_1, window_bounds = array<i64: 24, 512>}, {pipeline_mode = #tpu.pipeline_mode<synchronous>, transform_indices = @transform_2, window_bounds = array<i64: 1, 128>}, {pipeline_mode = #tpu.pipeline_mode<synchronous>, transform_indices = @transform_3, window_bounds = array<i64: 3, 128, 128>}, {pipeline_mode = #tpu.pipeline_mode<synchronous>, transform_indices = @transform_4, window_bounds = array<i64: 3, 1, 128>}, {pipeline_mode = #tpu.pipeline_mode<synchronous>, transform_indices = @transform_5, window_bounds = array<i64: 128, 2>}, {pipeline_mode = #tpu.pipeline_mode<synchronous>, transform_indices = @transform_6, window_bounds = array<i64: 1, 2>}, {transform_indices = @transform_7, window_bounds = array<i64: 2, 2>}]} {
    %c0 = arith.constant 0 : index
    %c0_0 = arith.constant 0 : index
    %0 = vector.load %arg1[%c0, %c0_0] : memref<2x24xf32, #tpu.memory_space<vmem>>, vector<2x24xf32>
    %c0_1 = arith.constant 0 : index
    %c0_2 = arith.constant 0 : index
    %1 = vector.load %arg2[%c0_1, %c0_2] : memref<24x512xf32, #tpu.memory_space<vmem>>, vector<24x512xf32>
    %cst = arith.constant dense<0.000000e+00> : vector<2x512xf32>
    %2 = tpu.matmul %0, %1, %cst {dimension_numbers = #tpu.dot_dimension_numbers<[1], [0], [0], [1], [0, 0, 1, 1], [], []>} : vector<2x24xf32>, vector<24x512xf32>, vector<2x512xf32> -> vector<2x512xf32>
    %3 = vector.extract_strided_slice %2 {offsets = [0, 0], sizes = [2, 128], strides = [1, 1]} : vector<2x512xf32> to vector<2x128xf32>
    %c0_3 = arith.constant 0 : index
    %c0_4 = arith.constant 0 : index
    %4 = vector.load %arg3[%c0_3, %c0_4] : memref<1x128xf32, #tpu.memory_space<vmem>>, vector<1x128xf32>
    %5 = vector.broadcast %4 : vector<1x128xf32> to vector<2x128xf32>
    %6 = arith.addf %3, %5 : vector<2x128xf32>
    %cst_5 = arith.constant 0.000000e+00 : f32
    %7 = vector.broadcast %cst_5 : f32 to vector<2x128xf32>
    %8 = arith.maximumf %6, %7 : vector<2x128xf32>
    %c0_6 = arith.constant 0 : index
    %c0_7 = arith.constant 0 : index
    %c0_8 = arith.constant 0 : index
    %9 = vector.load %arg4[%c0_6, %c0_7, %c0_8] : memref<3x128x128xf32, #tpu.memory_space<vmem>>, vector<1x128x128xf32>
    %10 = vector.shape_cast %9 : vector<1x128x128xf32> to vector<128x128xf32>
    %cst_9 = arith.constant dense<0.000000e+00> : vector<2x128xf32>
    %11 = tpu.matmul %8, %10, %cst_9 {dimension_numbers = #tpu.dot_dimension_numbers<[1], [0], [0], [1], [0, 0, 1, 1], [], []>} : vector<2x128xf32>, vector<128x128xf32>, vector<2x128xf32> -> vector<2x128xf32>
    %12 = vector.extract_strided_slice %2 {offsets = [0, 128], sizes = [2, 128], strides = [1, 1]} : vector<2x512xf32> to vector<2x128xf32>
    %13 = arith.addf %11, %12 : vector<2x128xf32>
    %c0_10 = arith.constant 0 : index
    %c0_11 = arith.constant 0 : index
    %c0_12 = arith.constant 0 : index
    %14 = vector.load %arg5[%c0_10, %c0_11, %c0_12] : memref<3x1x128xf32, #tpu.memory_space<vmem>>, vector<1x1x128xf32>
    %15 = vector.shape_cast %14 : vector<1x1x128xf32> to vector<1x128xf32>
    %16 = vector.broadcast %15 : vector<1x128xf32> to vector<2x128xf32>
    %17 = arith.addf %13, %16 : vector<2x128xf32>
    %cst_13 = arith.constant 0.000000e+00 : f32
    %18 = vector.broadcast %cst_13 : f32 to vector<2x128xf32>
    %19 = arith.maximumf %17, %18 : vector<2x128xf32>
    %c1 = arith.constant 1 : index
    %c0_14 = arith.constant 0 : index
    %c0_15 = arith.constant 0 : index
    %20 = vector.load %arg4[%c1, %c0_14, %c0_15] : memref<3x128x128xf32, #tpu.memory_space<vmem>>, vector<1x128x128xf32>
    %21 = vector.shape_cast %20 : vector<1x128x128xf32> to vector<128x128xf32>
    %cst_16 = arith.constant dense<0.000000e+00> : vector<2x128xf32>
    %22 = tpu.matmul %19, %21, %cst_16 {dimension_numbers = #tpu.dot_dimension_numbers<[1], [0], [0], [1], [0, 0, 1, 1], [], []>} : vector<2x128xf32>, vector<128x128xf32>, vector<2x128xf32> -> vector<2x128xf32>
    %23 = vector.extract_strided_slice %2 {offsets = [0, 256], sizes = [2, 128], strides = [1, 1]} : vector<2x512xf32> to vector<2x128xf32>
    %24 = arith.addf %22, %23 : vector<2x128xf32>
    %c1_17 = arith.constant 1 : index
    %c0_18 = arith.constant 0 : index
    %c0_19 = arith.constant 0 : index
    %25 = vector.load %arg5[%c1_17, %c0_18, %c0_19] : memref<3x1x128xf32, #tpu.memory_space<vmem>>, vector<1x1x128xf32>
    %26 = vector.shape_cast %25 : vector<1x1x128xf32> to vector<1x128xf32>
    %27 = vector.broadcast %26 : vector<1x128xf32> to vector<2x128xf32>
    %28 = arith.addf %24, %27 : vector<2x128xf32>
    %cst_20 = arith.constant 0.000000e+00 : f32
    %29 = vector.broadcast %cst_20 : f32 to vector<2x128xf32>
    %30 = arith.maximumf %28, %29 : vector<2x128xf32>
    %c2 = arith.constant 2 : index
    %c0_21 = arith.constant 0 : index
    %c0_22 = arith.constant 0 : index
    %31 = vector.load %arg4[%c2, %c0_21, %c0_22] : memref<3x128x128xf32, #tpu.memory_space<vmem>>, vector<1x128x128xf32>
    %32 = vector.shape_cast %31 : vector<1x128x128xf32> to vector<128x128xf32>
    %cst_23 = arith.constant dense<0.000000e+00> : vector<2x128xf32>
    %33 = tpu.matmul %30, %32, %cst_23 {dimension_numbers = #tpu.dot_dimension_numbers<[1], [0], [0], [1], [0, 0, 1, 1], [], []>} : vector<2x128xf32>, vector<128x128xf32>, vector<2x128xf32> -> vector<2x128xf32>
    %34 = vector.extract_strided_slice %2 {offsets = [0, 384], sizes = [2, 128], strides = [1, 1]} : vector<2x512xf32> to vector<2x128xf32>
    %35 = arith.addf %33, %34 : vector<2x128xf32>
    %c2_24 = arith.constant 2 : index
    %c0_25 = arith.constant 0 : index
    %c0_26 = arith.constant 0 : index
    %36 = vector.load %arg5[%c2_24, %c0_25, %c0_26] : memref<3x1x128xf32, #tpu.memory_space<vmem>>, vector<1x1x128xf32>
    %37 = vector.shape_cast %36 : vector<1x1x128xf32> to vector<1x128xf32>
    %38 = vector.broadcast %37 : vector<1x128xf32> to vector<2x128xf32>
    %39 = arith.addf %35, %38 : vector<2x128xf32>
    %cst_27 = arith.constant 0.000000e+00 : f32
    %40 = vector.broadcast %cst_27 : f32 to vector<2x128xf32>
    %41 = arith.maximumf %39, %40 : vector<2x128xf32>
    %c0_28 = arith.constant 0 : index
    %c0_29 = arith.constant 0 : index
    %42 = vector.load %arg6[%c0_28, %c0_29] : memref<128x2xf32, #tpu.memory_space<vmem>>, vector<128x2xf32>
    %cst_30 = arith.constant dense<0.000000e+00> : vector<2x2xf32>
    %43 = tpu.matmul %41, %42, %cst_30 {dimension_numbers = #tpu.dot_dimension_numbers<[1], [0], [0], [1], [0, 0, 1, 1], [], []>} : vector<2x128xf32>, vector<128x2xf32>, vector<2x2xf32> -> vector<2x2xf32>
    %c0_31 = arith.constant 0 : index
    %c0_32 = arith.constant 0 : index
    %44 = vector.load %arg7[%c0_31, %c0_32] : memref<1x2xf32, #tpu.memory_space<vmem>>, vector<1x2xf32>
    %45 = vector.broadcast %44 : vector<1x2xf32> to vector<2x2xf32>
    %46 = arith.addf %43, %45 : vector<2x2xf32>
    %c0_33 = arith.constant 0 : index
    %c0_34 = arith.constant 0 : index
    %47 = vector.load %arg8[%c0_33, %c0_34] : memref<2x2xf32, #tpu.memory_space<vmem>>, vector<2x2xf32>
    tpu.vector_store %arg8[%c0_33, %c0_34], %46 {strides = array<i32>} : memref<2x2xf32, #tpu.memory_space<vmem>>, vector<2x2xf32>,
    return
  }
  func.func @transform_0(%arg0: i32) -> (i32, i32) {
    %c0_i32 = arith.constant 0 : i32
    %c0_i32_0 = arith.constant 0 : i32
    return %arg0, %c0_i32 : i32, i32
  }
  func.func @transform_1(%arg0: i32) -> (i32, i32) {
    %c0_i32 = arith.constant 0 : i32
    %c0_i32_0 = arith.constant 0 : i32
    %c0_i32_1 = arith.constant 0 : i32
    return %c0_i32, %c0_i32_0 : i32, i32
  }
  func.func @transform_2(%arg0: i32) -> (i32, i32) {
    %c0_i32 = arith.constant 0 : i32
    %c0_i32_0 = arith.constant 0 : i32
    %c0_i32_1 = arith.constant 0 : i32
    return %c0_i32, %c0_i32_0 : i32, i32
  }
  func.func @transform_3(%arg0: i32) -> (i32, i32, i32) {
    %c0_i32 = arith.constant 0 : i32
    %c0_i32_0 = arith.constant 0 : i32
    %c0_i32_1 = arith.constant 0 : i32
    %c0_i32_2 = arith.constant 0 : i32
    return %c0_i32, %c0_i32_0, %c0_i32_1 : i32, i32, i32
  }
  func.func @transform_4(%arg0: i32) -> (i32, i32, i32) {
    %c0_i32 = arith.constant 0 : i32
    %c0_i32_0 = arith.constant 0 : i32
    %c0_i32_1 = arith.constant 0 : i32
    %c0_i32_2 = arith.constant 0 : i32
    return %c0_i32, %c0_i32_0, %c0_i32_1 : i32, i32, i32
  }
  func.func @transform_5(%arg0: i32) -> (i32, i32) {
    %c0_i32 = arith.constant 0 : i32
    %c0_i32_0 = arith.constant 0 : i32
    %c0_i32_1 = arith.constant 0 : i32
    return %c0_i32, %c0_i32_0 : i32, i32
  }
  func.func @transform_6(%arg0: i32) -> (i32, i32) {
    %c0_i32 = arith.constant 0 : i32
    %c0_i32_0 = arith.constant 0 : i32
    %c0_i32_1 = arith.constant 0 : i32
    return %c0_i32, %c0_i32_0 : i32, i32
  }
  func.func @transform_7(%arg0: i32) -> (i32, i32) {
    %c0_i32 = arith.constant 0 : i32
    %c0_i32_0 = arith.constant 0 : i32
    return %arg0, %c0_i32 : i32, i32
  }
}

</mosaic_0001>

<bundles_post_ra>
// kernel: tpu_custom_call.1
= control target key start
LH: loop header
LB: loop body
LE: loop exit
PB: predicated region body
PF: predicated region fallthrough
CT: control target
= control target key end

     0   :  { %12 = vsyncpa [#allocation3], 0  ;;  %s1109_s0 = inlined_call_operand.vmem [shape: f32[2,24], index: 0, kind: input, shape index: {}]   ;;  %s1110_s1 = inlined_call_operand.vmem [shape: f32[24,512], index: 1, kind: input, shape index: {}]   ;;  %s1111_s2 = inlined_call_operand.vmem [shape: f32[1,128], index: 2, kind: input, shape index: {}]   ;;  %s1112_s3 = inlined_call_operand.hbm [shape: f32[3,128,128], index: 3, kind: input, shape index: {}]   ;;  %s1113_s4 = inlined_call_operand.vmem [shape: f32[3,1,128], index: 4, kind: input, shape index: {}]   ;;  %s1114_s5 = inlined_call_operand.vmem [shape: f32[128,2], index: 5, kind: input, shape index: {}]   ;;  %s1115_s6 = inlined_call_operand.vmem [shape: f32[1,2], index: 6, kind: input, shape index: {}]   ;;  %s1116_s7 = inlined_call_operand.hbm [shape: f32[2,2], index: 7, kind: output, shape index: {}]  }
   0x1   :  { %13 = vsyncpa [#allocation4], 0  ;;  %s875_s24 = smov [#allocation2]  }
   0x2   :  { %s25_s25 = sshll.u32 %s875_s24, 4  ;;  %s26_s25 = int_to_ptr.vmem [resolvable:$true] %s25_s25 }
   0x3   :  { %s839_s26 = scalar_lea.vmem %s26_s25, 6144  ;;  %p844_p1 = scmp.lt.s32.totalorder %s26_s25, %s26_s25 }
   0x4   :  { %p840_p0 = scmp.ne.s32.totalorder %s26_s25, %s839_s26  ;;  %p845_p2 = scmp.lt.s32.totalorder %s839_s26, %s839_s26 }
   0x6   :  { %p846_p3 = por %p845_p2, %p844_p1 }
   0x8   :  { %p847_p4 = pnand %p846_p3, %p840_p0 }
   0xa   :  { %850 = shalt.err (!%p847_p4)
}
   0xb   :  { %s876_s27 = smov 128   ;;  %s877_s28 = smov 8  }
   0xc   :  { %31 = dma.hbm_to_vmem [thread:$0]  %s1112_s3, 6144, %s26_s25, [#allocation3], %s876_s27, %s876_s27, %s877_s28  }
   0xd   :  { %871 = dma.done.wait [#allocation3], 6144  }
   0xe   :  { %872 = vsyncadd [#allocation3], 4294961152  ;;  %v878_v0 = vmov 0.0   ;;  %v51_v1 = vld [vmem:[%s1110_s1 + $0x48] sm:$0xff]  ;;  %v50_v2 = vld [vmem:[%s1110_s1 + $0x40] sm:$0xff]  ;;  %vm54_vm0 = vcmask 195584  }
   0xf   :  { %122 = vmatprep.mubr.f32.mxu0 %v878_v0  ;;  %193 = vmatprep.mubr.f32.mxu1 %v878_v0  ;;  %v47_v3 = vld [vmem:[%s1110_s1 + $0x28] sm:$0xff]  ;;  %v46_v4 = vld [vmem:[%s1110_s1 + $0x20] sm:$0xff]  ;;  %v224_v8 = vld [vmem:[#allocation2 + $0x78] sm:$0xff]  ;;  %vm879_vm1 = vmmov 0   ;;  %vm591_vm2 = vcmask 9216  }
  0x10   :  { %84 = vmatprep.subr.mxu0 %v51_v1  ;;  %v43_v5 = vld [vmem:[%s1110_s1 + $0x8] sm:$0xff]  ;;  %v42_v6 = vld [vmem:[%s1110_s1] sm:$0xff]  ;;  %v223_v9 = vld [vmem:[#allocation2 + $0x70] sm:$0xff] }
  0x11   :  { %85 = vmatpush1.msra.mxu0 %v50_v2  ;;  %v947_v7 = vld [vmem:[%s1109_s0] sm:$0x3]  ;;  %v222_v10 = vld [vmem:[#allocation2 + $0x68] sm:$0xff]  ;;  %v220_v12 = vld [vmem:[#allocation2 + $0x58] sm:$0xff]  ;;  %s880_s0 = smov [#allocation5]  }
  0x12   :  { %86 = vmatprep.subr.mxu0 %v47_v3  ;;  %v221_v11 = vld [vmem:[#allocation2 + $0x60] sm:$0xff]  ;;  %v219_v13 = vld [vmem:[#allocation2 + $0x50] sm:$0xff]  ;;  %v218_v14 = vld [vmem:[#allocation2 + $0x48] sm:$0xff]  ;;  %s599_s21 = sshll.u32 %s880_s0, 4  ;;  %s600_s21 = int_to_ptr.vmem [resolvable:$true] %s599_s21 }
  0x13   :  { %87 = vmatpush1.msra.mxu0 %v46_v4  ;;  %v217_v15 = vld [vmem:[#allocation2 + $0x40] sm:$0xff]  ;;  %v216_v16 = vld [vmem:[#allocation2 + $0x38] sm:$0xff]  ;;  %v215_v17 = vld [vmem:[#allocation2 + $0x30] sm:$0xff]  ;;  %p856_p6 = scmp.lt.s32.totalorder %s600_s21, %s600_s21 }
  0x14   :  { %88 = vmatprep.subr.mxu0 %v43_v5  ;;  %v214_v18 = vld [vmem:[#allocation2 + $0x28] sm:$0xff]  ;;  %v213_v19 = vld [vmem:[#allocation2 + $0x20] sm:$0xff]  ;;  %v212_v20 = vld [vmem:[#allocation2 + $0x18] sm:$0xff] }
  0x15   :  { %89 = vmatpush1.msra.mxu0 %v42_v6  ;;  %v211_v21 = vld [vmem:[#allocation2 + $0x10] sm:$0xff]  ;;  %v210_v22 = vld [vmem:[#allocation2 + $0x8] sm:$0xff]  ;;  %v209_v23 = vld [vmem:[#allocation2] sm:$0xff] }
  0x16   :  { %608 = vmatmul.mubr.msk.f32.vlgmr.msra.gmra.mxu0 %vm54_vm0, %v947_v7  ;;  %685 = vmatprep.subr.mxu0 %v878_v0  ;;  %v53_v24 = vld [vmem:[%s1110_s1 + $0x58] sm:$0xff]  ;;  %v52_v25 = vld [vmem:[%s1110_s1 + $0x50] sm:$0xff]  ;;  %v318_v32 = vld [vmem:[#allocation2 + $0xe8] sm:$0xff] }
  0x17   :  { %686 = vmatpush3.msra.mxu0 %v224_v8  ;;  %717 = vmatprep.mubr.msk.f32.mxu0 %vm879_vm1, %v878_v0  ;;  %v49_v26 = vld [vmem:[%s1110_s1 + $0x38] sm:$0xff]  ;;  %v48_v27 = vld [vmem:[%s1110_s1 + $0x30] sm:$0xff]  ;;  %v317_v33 = vld [vmem:[#allocation2 + $0xe0] sm:$0xff] }
  0x18   :  { %687 = vmatprep.subr.mxu0 %v878_v0  ;;  %155 = vmatprep.subr.mxu1 %v53_v24  ;;  %v45_v28 = vld [vmem:[%s1110_s1 + $0x18] sm:$0xff]  ;;  %v44_v29 = vld [vmem:[%s1110_s1 + $0x10] sm:$0xff]  ;;  %v314_v36 = vld [vmem:[#allocation2 + $0xc8] sm:$0xff] }
  0x19   :  { %688 = vmatpush3.msra.mxu0 %v223_v9  ;;  %156 = vmatpush1.msra.mxu1 %v52_v25  ;;  %v320_v30 = vld [vmem:[#allocation2 + $0xf8] sm:$0xff]  ;;  %v319_v31 = vld [vmem:[#allocation2 + $0xf0] sm:$0xff]  ;;  %v313_v37 = vld [vmem:[#allocation2 + $0xc0] sm:$0xff] }
  0x1a   :  { %689 = vmatprep.subr.mxu0 %v878_v0  ;;  %157 = vmatprep.subr.mxu1 %v49_v26  ;;  %v316_v34 = vld [vmem:[#allocation2 + $0xd8] sm:$0xff]  ;;  %v315_v35 = vld [vmem:[#allocation2 + $0xd0] sm:$0xff]  ;;  %v310_v40 = vld [vmem:[#allocation2 + $0xa8] sm:$0xff] }
  0x1b   :  { %690 = vmatpush3.msra.mxu0 %v222_v10  ;;  %158 = vmatpush1.msra.mxu1 %v48_v27  ;;  %v312_v38 = vld [vmem:[#allocation2 + $0xb8] sm:$0xff]  ;;  %v311_v39 = vld [vmem:[#allocation2 + $0xb0] sm:$0xff]  ;;  %v309_v41 = vld [vmem:[#allocation2 + $0xa0] sm:$0xff] }
  0x1c   :  { %691 = vmatprep.subr.mxu0 %v878_v0  ;;  %159 = vmatprep.subr.mxu1 %v45_v28  ;;  %v610_v42 = vld [vmem:[%s1111_s2] ss:$0 sm:$0xff]  ;;  %v308_v46 = vld [vmem:[#allocation2 + $0x98] sm:$0xff]  ;;  %v307_v47 = vld [vmem:[#allocation2 + $0x90] sm:$0xff] }
  0x1d   :  { %692 = vmatpush3.msra.mxu0 %v221_v11  ;;  %160 = vmatpush1.msra.mxu1 %v44_v29  ;;  %v306_v48 = vld [vmem:[#allocation2 + $0x88] sm:$0xff]  ;;  %v305_v49 = vld [vmem:[#allocation2 + $0x80] sm:$0xff]  ;;  %v417_v50 = vld [vmem:[#allocation2 + $0x178] sm:$0xff] }
  0x1e   :  { %693 = vmatprep.subr.mxu0 %v878_v0  ;;  %609 = vmatmul.mubr.msk.f32.vlgmr.msra.gmra.mxu1 %vm54_vm0, %v947_v7  ;;  %v416_v51 = vld [vmem:[#allocation2 + $0x170] sm:$0xff]  ;;  %v415_v52 = vld [vmem:[#allocation2 + $0x168] sm:$0xff]  ;;  %v414_v53 = vld [vmem:[#allocation2 + $0x160] sm:$0xff] }
  0x1f   :  { %694 = vmatpush3.msra.mxu0 %v220_v12  ;;  %720 = vmatprep.subr.mxu1 %v878_v0  ;;  %v413_v54 = vld [vmem:[#allocation2 + $0x158] sm:$0xff]  ;;  %v412_v55 = vld [vmem:[#allocation2 + $0x150] sm:$0xff]  ;;  %v411_v56 = vld [vmem:[#allocation2 + $0x148] sm:$0xff] }
  0x20   :  { %695 = vmatprep.subr.mxu0 %v878_v0  ;;  %721 = vmatpush3.msra.mxu1 %v320_v30  ;;  %v410_v57 = vld [vmem:[#allocation2 + $0x140] sm:$0xff]  ;;  %v409_v58 = vld [vmem:[#allocation2 + $0x138] sm:$0xff]  ;;  %v408_v59 = vld [vmem:[#allocation2 + $0x130] sm:$0xff] }
  0x21   :  { %696 = vmatpush3.msra.mxu0 %v219_v13  ;;  %752 = vmatprep.mubr.msk.f32.mxu1 %vm879_vm1, %v878_v0  ;;  %v407_v60 = vld [vmem:[#allocation2 + $0x128] sm:$0xff]  ;;  %v406_v61 = vld [vmem:[#allocation2 + $0x120] sm:$0xff]  ;;  %v405_v6 = vld [vmem:[#allocation2 + $0x118] sm:$0xff] }
  0x22   :  { %697 = vmatprep.subr.mxu0 %v878_v0  ;;  %722 = vmatprep.subr.mxu1 %v878_v0  ;;  %v611_v1 = vld [vmem:[%s1113_s4] ss:$0 sm:$0xff]  ;;  %v404_v7 = vld [vmem:[#allocation2 + $0x110] sm:$0xff]  ;;  %v403_v8 = vld [vmem:[#allocation2 + $0x108] sm:$0xff] }
  0x23   :  { %698 = vmatpush3.msra.mxu0 %v218_v14  ;;  %723 = vmatpush3.msra.mxu1 %v319_v31  ;;  %v402_v9 = vld [vmem:[#allocation2 + $0x100] sm:$0xff]  ;;  %v513_v10 = vld [vmem:[%s1114_s5 + $0x78] sm:$0xff]  ;;  %v512_v11 = vld [vmem:[%s1114_s5 + $0x70] sm:$0xff] }
  0x24   :  { %699 = vmatprep.subr.mxu0 %v878_v0  ;;  %724 = vmatprep.subr.mxu1 %v878_v0  ;;  %v511_v12 = vld [vmem:[%s1114_s5 + $0x68] sm:$0xff]  ;;  %v510_v13 = vld [vmem:[%s1114_s5 + $0x60] sm:$0xff]  ;;  %v509_v14 = vld [vmem:[%s1114_s5 + $0x58] sm:$0xff] }
  0x25   :  { %700 = vmatpush3.msra.mxu0 %v217_v15  ;;  %725 = vmatpush3.msra.mxu1 %v318_v32  ;;  %v508_v15 = vld [vmem:[%s1114_s5 + $0x50] sm:$0xff]  ;;  %v613_v25 = vld [vmem:[%s1113_s4 + $0x1] ss:$0 sm:$0xff]  ;;  %v501_v30 = vld [vmem:[%s1114_s5 + $0x18] sm:$0xff] }
  0x26   :  { %701 = vmatprep.subr.mxu0 %v878_v0  ;;  %726 = vmatprep.subr.mxu1 %v878_v0  ;;  %v500_v31 = vld [vmem:[%s1114_s5 + $0x10] sm:$0xff]  ;;  %v499_v32 = vld [vmem:[%s1114_s5 + $0x8] sm:$0xff] }
  0x27   :  { %702 = vmatpush3.msra.mxu0 %v216_v16  ;;  %727 = vmatpush3.msra.mxu1 %v317_v33  ;;  %v507_v16 = vld [vmem:[%s1114_s5 + $0x48] sm:$0xff]  ;;  %v498_v33 = vld [vmem:[%s1114_s5] sm:$0xff] }
  0x28   :  { %703 = vmatprep.subr.mxu0 %v878_v0  ;;  %728 = vmatprep.subr.mxu1 %v878_v0 }
  0x29   :  { %704 = vmatpush3.msra.mxu0 %v215_v17  ;;  %729 = vmatpush3.msra.mxu1 %v316_v34  ;;  %v506_v17 = vld [vmem:[%s1114_s5 + $0x40] sm:$0xff] }
  0x2a   :  { %705 = vmatprep.subr.mxu0 %v878_v0  ;;  %730 = vmatprep.subr.mxu1 %v878_v0 }
  0x2b   :  { %706 = vmatpush3.msra.mxu0 %v214_v18  ;;  %731 = vmatpush3.msra.mxu1 %v315_v35  ;;  %v505_v18 = vld [vmem:[%s1114_s5 + $0x38] sm:$0xff]  ;;  %v615_v35 = vld [vmem:[%s1113_s4 + $0x2] ss:$0 sm:$0xff] }
  0x2c   :  { %707 = vmatprep.subr.mxu0 %v878_v0  ;;  %732 = vmatprep.subr.mxu1 %v878_v0 }
  0x2d   :  { %708 = vmatpush3.msra.mxu0 %v213_v19  ;;  %733 = vmatpush3.msra.mxu1 %v314_v36  ;;  %v504_v19 = vld [vmem:[%s1114_s5 + $0x30] sm:$0xff] }
  0x2e   :  { %709 = vmatprep.subr.mxu0 %v878_v0  ;;  %734 = vmatprep.subr.mxu1 %v878_v0 }
  0x2f   :  { %710 = vmatpush3.msra.mxu0 %v212_v20  ;;  %735 = vmatpush3.msra.mxu1 %v313_v37  ;;  %v503_v20 = vld [vmem:[%s1114_s5 + $0x28] sm:$0xff] }
  0x30   :  { %711 = vmatprep.subr.mxu0 %v878_v0  ;;  %736 = vmatprep.subr.mxu1 %v878_v0 }
  0x31   :  { %712 = vmatpush3.msra.mxu0 %v211_v21  ;;  %737 = vmatpush3.msra.mxu1 %v312_v38  ;;  %v502_v21 = vld [vmem:[%s1114_s5 + $0x20] sm:$0xff]  ;;  %s851_s5 = scalar_lea.vmem %s600_s21, 32 }
  0x32   :  { %713 = vmatprep.subr.mxu0 %v878_v0  ;;  %738 = vmatprep.subr.mxu1 %v878_v0  ;;  %p852_p5 = scmp.ne.s32.totalorder %s600_s21, %s851_s5  ;;  %p857_p7 = scmp.lt.s32.totalorder %s851_s5, %s851_s5 }
  0x33   :  { %714 = vmatpush3.msra.mxu0 %v210_v22  ;;  %739 = vmatpush3.msra.mxu1 %v311_v39 }
  0x34   :  { %715 = vmatprep.subr.mxu0 %v878_v0  ;;  %740 = vmatprep.subr.mxu1 %v878_v0  ;;  %p858_p8 = por %p857_p7, %p856_p6 }
  0x35   :  { %716 = vmatpush3.msra.mxu0 %v209_v23  ;;  %741 = vmatpush3.msra.mxu1 %v310_v40  ;;  %v616_v40 = vld [vmem:[%s1115_s6] ss:$0 sm:$0xff] }
  0x36   :  { %755 = vmatprep.subr.mxu0 %v878_v0  ;;  %742 = vmatprep.subr.mxu1 %v878_v0  ;;  %p859_p9 = pnand %p858_p8, %p852_p5 }
  0x37   :  { %743 = vmatpush3.msra.mxu1 %v309_v41 }
  0x38   :  { %744 = vmatprep.subr.mxu1 %v878_v0 }
  0x39   :  { %745 = vmatpush3.msra.mxu1 %v308_v46 }
  0x3a   :  { %746 = vmatprep.subr.mxu1 %v878_v0 }
  0x3b   :  { %747 = vmatpush3.msra.mxu1 %v307_v47 }
  0x3c   :  { %748 = vmatprep.subr.mxu1 %v878_v0 }
  0x3d   :  { %749 = vmatpush3.msra.mxu1 %v306_v48 }
  0x3e   :  { %750 = vmatprep.subr.mxu1 %v878_v0 }
  0x3f   :  { %751 = vmatpush3.msra.mxu1 %v305_v49 }
  0x40   :  { %790 = vmatprep.subr.mxu1 %v878_v0 }
  0xd6   :  { %v124_v43 = vpop.f32.mrf.mxu0 }
  0xd7   :  { %v207_v44 = vadd.f32 %v610_v42, %v124_v43 }
  0xd8   :  { %v126_v62 = vpop.f32.mrf.mxu0 }
  0xd9   :  { %v208_v45 = vmax.f32 %v207_v44, 0.0 }
  0xdb   :  { %718 = vmatmul.mubr.f32.vlgmr.msra.gmra.mxu0 %v208_v45 }
  0xdc   :  { %787 = vmatprep.mubr.msk.f32.mxu0 %vm879_vm1, %v878_v0  ;;  %756 = vmatpush3.msra.mxu0 %v417_v50 }
  0xdd   :  { %757 = vmatprep.subr.mxu0 %v878_v0 }
  0xde   :  { %758 = vmatpush3.msra.mxu0 %v416_v51  ;;  %v195_v22 = vpop.f32.mrf.mxu1 }
  0xdf   :  { %759 = vmatprep.subr.mxu0 %v878_v0 }
  0xe0   :  { %760 = vmatpush3.msra.mxu0 %v415_v52  ;;  %v197_v23 = vpop.f32.mrf.mxu1 }
  0xe1   :  { %761 = vmatprep.subr.mxu0 %v878_v0 }
  0xe2   :  { %762 = vmatpush3.msra.mxu0 %v414_v53 }
  0xe3   :  { %763 = vmatprep.subr.mxu0 %v878_v0 }
  0xe4   :  { %764 = vmatpush3.msra.mxu0 %v413_v54 }
  0xe5   :  { %765 = vmatprep.subr.mxu0 %v878_v0 }
  0xe6   :  { %766 = vmatpush3.msra.mxu0 %v412_v55 }
  0xe7   :  { %767 = vmatprep.subr.mxu0 %v878_v0 }
  0xe8   :  { %768 = vmatpush3.msra.mxu0 %v411_v56 }
  0xe9   :  { %769 = vmatprep.subr.mxu0 %v878_v0 }
  0xea   :  { %770 = vmatpush3.msra.mxu0 %v410_v57 }
  0xeb   :  { %771 = vmatprep.subr.mxu0 %v878_v0 }
  0xec   :  { %772 = vmatpush3.msra.mxu0 %v409_v58 }
  0xed   :  { %773 = vmatprep.subr.mxu0 %v878_v0 }
  0xee   :  { %774 = vmatpush3.msra.mxu0 %v408_v59 }
  0xef   :  { %775 = vmatprep.subr.mxu0 %v878_v0 }
  0xf0   :  { %776 = vmatpush3.msra.mxu0 %v407_v60 }
  0xf1   :  { %777 = vmatprep.subr.mxu0 %v878_v0 }
  0xf2   :  { %778 = vmatpush3.msra.mxu0 %v406_v61 }
  0xf3   :  { %779 = vmatprep.subr.mxu0 %v878_v0 }
  0xf4   :  { %780 = vmatpush3.msra.mxu0 %v405_v6 }
  0xf5   :  { %781 = vmatprep.subr.mxu0 %v878_v0 }
  0xf6   :  { %782 = vmatpush3.msra.mxu0 %v404_v7 }
  0xf7   :  { %783 = vmatprep.subr.mxu0 %v878_v0 }
  0xf8   :  { %784 = vmatpush3.msra.mxu0 %v403_v8 }
  0xf9   :  { %785 = vmatprep.subr.mxu0 %v878_v0 }
  0xfa   :  { %786 = vmatpush3.msra.mxu0 %v402_v9 }
 0x19b   :  { %v291_v63 = vpop.f32.mrf.mxu0 }
 0x19c   :  { %v292_v2 = vadd.f32 %v291_v63, %v126_v62 }
 0x19d   :  { %v719_v3 = vpop.f32.mrf.mxu0 }
 0x19e   :  { %v302_v4 = vadd.f32 %v611_v1, %v292_v2 }
 0x1a0   :  { %v303_v5 = vmax.f32 %v302_v4, 0.0 }
 0x1a2   :  { %753 = vmatmul.mubr.f32.vlgmr.msra.gmra.mxu1 %v303_v5 }
 0x1a3   :  { %822 = vmatprep.mubr.msk.f32.mxu1 %vm879_vm1, %v878_v0  ;;  %791 = vmatpush3.msra.mxu1 %v513_v10 }
 0x1a4   :  { %792 = vmatprep.subr.mxu1 %v878_v0 }
 0x1a5   :  { %793 = vmatpush3.msra.mxu1 %v512_v11 }
 0x1a6   :  { %794 = vmatprep.subr.mxu1 %v878_v0 }
 0x1a7   :  { %795 = vmatpush3.msra.mxu1 %v511_v12 }
 0x1a8   :  { %796 = vmatprep.subr.mxu1 %v878_v0 }
 0x1a9   :  { %797 = vmatpush3.msra.mxu1 %v510_v13 }
 0x1aa   :  { %798 = vmatprep.subr.mxu1 %v878_v0 }
 0x1ab   :  { %799 = vmatpush3.msra.mxu1 %v509_v14 }
 0x1ac   :  { %800 = vmatprep.subr.mxu1 %v878_v0 }
 0x1ad   :  { %801 = vmatpush3.msra.mxu1 %v508_v15 }
 0x1ae   :  { %802 = vmatprep.subr.mxu1 %v878_v0 }
 0x1af   :  { %803 = vmatpush3.msra.mxu1 %v507_v16 }
 0x1b0   :  { %804 = vmatprep.subr.mxu1 %v878_v0 }
 0x1b1   :  { %805 = vmatpush3.msra.mxu1 %v506_v17 }
 0x1b2   :  { %806 = vmatprep.subr.mxu1 %v878_v0 }
 0x1b3   :  { %807 = vmatpush3.msra.mxu1 %v505_v18 }
 0x1b4   :  { %808 = vmatprep.subr.mxu1 %v878_v0 }
 0x1b5   :  { %809 = vmatpush3.msra.mxu1 %v504_v19 }
 0x1b6   :  { %810 = vmatprep.subr.mxu1 %v878_v0 }
 0x1b7   :  { %811 = vmatpush3.msra.mxu1 %v503_v20 }
 0x1b8   :  { %812 = vmatprep.subr.mxu1 %v878_v0 }
 0x1b9   :  { %813 = vmatpush3.msra.mxu1 %v502_v21 }
 0x1ba   :  { %814 = vmatprep.subr.mxu1 %v878_v0 }
 0x1bb   :  { %815 = vmatpush3.msra.mxu1 %v501_v30 }
 0x1bc   :  { %816 = vmatprep.subr.mxu1 %v878_v0 }
 0x1bd   :  { %817 = vmatpush3.msra.mxu1 %v500_v31 }
 0x1be   :  { %818 = vmatprep.subr.mxu1 %v878_v0 }
 0x1bf   :  { %819 = vmatpush3.msra.mxu1 %v499_v32 }
 0x1c0   :  { %820 = vmatprep.subr.mxu1 %v878_v0 }
 0x1c1   :  { %821 = vmatpush3.msra.mxu1 %v498_v33 }
 0x262   :  { %v387_v24 = vpop.f32.mrf.mxu1 }
 0x263   :  { %v388_v26 = vadd.f32 %v387_v24, %v195_v22 }
 0x264   :  { %v754_v27 = vpop.f32.mrf.mxu1 }
 0x265   :  { %v399_v28 = vadd.f32 %v613_v25, %v388_v26 }
 0x267   :  { %v400_v29 = vmax.f32 %v399_v28, 0.0 }
 0x269   :  { %788 = vmatmul.mubr.f32.vlgmr.msra.gmra.mxu0 %v400_v29 }
 0x329   :  { %v484_v34 = vpop.f32.mrf.mxu0 }
 0x32a   :  { %v485_v36 = vadd.f32 %v484_v34, %v197_v23 }
 0x32b   :  { %v789_v37 = vpop.f32.mrf.mxu0 }
 0x32c   :  { %v496_v38 = vadd.f32 %v615_v35, %v485_v36 }
 0x32e   :  { %v497_v39 = vmax.f32 %v496_v38, 0.0 }
 0x330   :  { %823 = vmatmul.mubr.f32.vlgmr.msra.gmra.mxu1 %v497_v39 }
 0x3f0   :  { %v587_v0 = vpop.f32.mrf.mxu1 }
 0x3f1   :  { %v588_v41 = vadd.f32 %v616_v40, %v587_v0 }
 0x3f2   :  { %v824_v42 = vpop.f32.mrf.mxu1 }
 0x3f3   :  { %592 = vst.msk [vmem:[#allocation5] sm:$0x3] %vm591_vm2, %v588_v41 }
 0x3f4   :  { %862 = shalt.err (!%p859_p9)
}
 0x3f5   :  { %602 = dma.vmem_to_hbm [thread:$0]  %s600_s21, 32, %s1116_s7, [#allocation4]  }
 0x3f6   :  { %873 = dma.done.wait [#allocation4], 32  }
 0x3f7   :  { %874 = vsyncadd [#allocation4], 4294967264 }
 0x3f8   :  { %606 = vsyncpa [#allocation3], 1 }
 0x3f9   :  { %607 = vsyncpa [#allocation4], 1 }

</bundles_post_ra>
